<compile_context>
chip_gen: v5e
topology: v5e:2x2
jax: 0.10.0
libtpu: 0.0.40
codegen_flags: <defaults>
</compile_context>

<pallas_src>
import functools

import numpy as np
import jax
import jax.numpy as jnp
from jax.experimental import pallas as pl
from jax.experimental.pallas import tpu as pltpu


def _classifier_kernel(x_ref, coords_ref, sfg_ref, tfg_ref, sbg_ref, tbg_ref,
                       wfgf_ref, wbgf_ref, bfg_ref, bbg_ref, bfine_ref, wffl_ref,
                       coarse_ref, fine_ref, stk_ref, *, H, W):
    C = x_ref.shape[1]
    HW = H * W
    S2 = 2 * HW

    x = x_ref[0].astype(jnp.float32)                       # (C, HW), spatial on lanes

    # BatchNorm (folded per-channel scale/shift, separate affine per branch) + ReLU.
    xr_fg = jnp.maximum(x * sfg_ref[...] + tfg_ref[...], 0.0)       # (C, HW)
    xr_bg = jnp.maximum(x * sbg_ref[...] + tbg_ref[...], 0.0)       # (C, HW)
    # Both branches share the SAME conv_block, so all shift/mask work runs once on the
    # [foreground || background] slab.  Lane concat at a 128-multiple boundary is
    # vreg-granular (no relayout).
    xboth = jnp.concatenate([xr_fg, xr_bg], axis=1)                  # (C, 2*HW)

    # In-image (row, col) coordinates for every lane position (same in both halves).
    hh = coords_ref[0:1, :]                                          # (1, 2*HW) int32
    ww = coords_ref[1:2, :]                                          # (1, 2*HW) int32

    # 3x3 SAME conv with the 1x1 heads already folded into the tap weights.
    # Each tap = lane roll (XLU) + 0/1 border mask (VPU compares); the 9 shifted slabs
    # are stacked into a (9*C, 2*HW) VMEM slab so the tap/channel contraction is a
    # single stacked-K matmul per branch.
    # NOTE: every roll wrap across the fg/bg boundary (and the slab ends) lands on an
    # out-of-image tap that the mask zeroes -- do not change the lane layout without
    # revisiting this invariant.
    row = 0
    for dy in (-1, 0, 1):
        for dx in (-1, 0, 1):
            shift = (-(dy * W + dx)) % S2
            sh = pltpu.roll(xboth, shift=shift, axis=1) if shift else xboth
            if dy != 0 or dx != 0:
                valid = ((hh + dy >= 0) & (hh + dy < H) &
                         (ww + dx >= 0) & (ww + dx < W)).astype(jnp.float32)
                sh = sh * valid
            stk_ref[row:row + C, :] = sh
            row += C

    # Foreground half needs n_fine head rows, background half only 1 row.
    heads_fg = jnp.dot(wfgf_ref[...], stk_ref[:, :HW],
                       preferred_element_type=jnp.float32)           # (n_fine, HW)
    bg_logit = jnp.dot(wbgf_ref[...], stk_ref[:, HW:],
                       preferred_element_type=jnp.float32) + bbg_ref[...]   # (1, HW)
    fg_logit = heads_fg[0:1, :] + bfg_ref[...]                        # (1, HW)
    fine_split = heads_fg[1:, :] + wffl_ref[...] * fg_logit + bfine_ref[...]

    # One lane-dense store per output: coarse=[bg,fg], fine=[bg,fine_split].
    coarse_ref[0] = jnp.concatenate([bg_logit, fg_logit], axis=0)
    fine_ref[0] = jnp.concatenate([bg_logit, fine_split], axis=0)


def init_params(key, C, n_fine):
    ks = jax.random.split(key, 12)
    w3 = jax.random.normal(ks[0], (3, 3, C, C), jnp.float32) * 0.2        # shared conv_block (HWIO)
    b3 = jax.random.normal(ks[1], (C,), jnp.float32) * 0.1
    wfg = jax.random.normal(ks[2], (1, C), jnp.float32) * 0.2             # coarse_feat2logit 1x1
    bfg = jax.random.normal(ks[3], (1,), jnp.float32) * 0.1
    wbg = jax.random.normal(ks[4], (1, C), jnp.float32) * 0.2             # coarse_background tail 1x1
    bbg = jax.random.normal(ks[5], (1,), jnp.float32) * 0.1
    wff = jax.random.normal(ks[6], (n_fine - 1, C + 1), jnp.float32) * 0.2  # coarse_feat2feat 1x1
    bff = jax.random.normal(ks[7], (n_fine - 1,), jnp.float32) * 0.1
    # Distinct BatchNorm affine params per branch (foreground / background).
    g_fg = 1.0 + 0.1 * jax.random.normal(ks[8], (C,), jnp.float32)
    be_fg = 0.1 * jax.random.normal(ks[9], (C,), jnp.float32)
    g_bg = 1.0 + 0.1 * jax.random.normal(ks[10], (C,), jnp.float32)
    be_bg = 0.1 * jax.random.normal(ks[11], (C,), jnp.float32)
    return (w3, b3, wfg, bfg, wbg, bbg, wff, bff, g_fg, be_fg, g_bg, be_bg)


@functools.partial(jax.jit, static_argnames=("n_fine", "input_dtype"))
def classifier_forward(x_nchw, params, n_fine, running_stats=None, eps=1e-5,
                       input_dtype=jnp.float32):
    (w3, b3, wfg, bfg, wbg, bbg, wff, bff, g_fg, be_fg, g_bg, be_bg) = params
    N, C, H, W = x_nchw.shape
    HW = H * W

    # NCHW -> (N, C, H*W): pure reshape (channels on sublanes, spatial on lanes).
    xf = x_nchw.reshape(N, C, HW).astype(jnp.float32)
    x_in = xf.astype(input_dtype)       # optional bf16 DMA stream into the kernel

    # BatchNorm statistics.  Train mode: numerically safe two-pass batch stats
    # (E[(x-mean)^2]); eval mode: pass running (mean, var) via `running_stats`.
    if running_stats is None:
        mean = jnp.mean(xf, axis=(0, 2))
        var = jnp.mean(jnp.square(xf - mean[None, :, None]), axis=(0, 2))
    else:
        mean, var = running_stats
    inv = jax.lax.rsqrt(var + eps)
    s_fg = (g_fg * inv)[:, None]                        # (C, 1) foreground BN scale
    t_fg = (be_fg - mean * g_fg * inv)[:, None]         # (C, 1) foreground BN shift
    s_bg = (g_bg * inv)[:, None]                        # (C, 1) background BN scale
    t_bg = (be_bg - mean * g_bg * inv)[:, None]         # (C, 1) background BN shift

    # Shared conv_block as 9 per-tap (C_out, C_in) matrices, tap order (ky, kx) row-major.
    w_taps = jnp.transpose(w3, (0, 1, 3, 2)).reshape(9, C, C)

    # Fold the 1x1 heads into the tap weights + fold the conv bias into the head biases.
    #   foreground rows: [coarse_feat2logit ; coarse_feat2feat[:, :C]]
    #   background row : [coarse_background tail]
    whfg = jnp.concatenate([wfg, wff[:, :C]], axis=0)                       # (n_fine, C)
    wfg_fold = jnp.einsum('ro,toc->rtc', whfg, w_taps).reshape(n_fine, 9 * C)
    wbg_fold = jnp.einsum('ro,toc->rtc', wbg, w_taps).reshape(1, 9 * C)
    bfg_fold = (wfg @ b3 + bfg).reshape(1, 1)                               # wfg.b3 + bfg
    bbg_fold = (wbg @ b3 + bbg).reshape(1, 1)
    bfine_fold = (wff[:, :C] @ b3 + bff).reshape(n_fine - 1, 1)
    wffl = wff[:, C:C + 1]                                                  # (n_fine-1, 1) weight on fg_logit

    # Tiny (2, 2*HW) int32 coordinate table (row, col) for in-kernel border masks.
    hh_np, ww_np = np.meshgrid(np.arange(H), np.arange(W), indexing="ij")
    coords = jnp.asarray(np.stack([np.tile(hh_np.reshape(-1), 2),
                                   np.tile(ww_np.reshape(-1), 2)], axis=0).astype(np.int32))

    # TODO(synk): for larger N on v5e/v6e, pack several images per grid step (lane concat;
    # the border masks already zero cross-image wrap) to amortize the ~0.35us/step overhead;
    # keep >=2 steps on v7x for the megacore split.
    # TODO(synk): for large H*W / C, add a spatial grid axis with halo handling so blocks
    # stay inside v7x's 64 MiB VMEM (here one image block is only a few KiB).
    kernel = pl.pallas_call(
        functools.partial(_classifier_kernel, H=H, W=W),
        out_shape=(jax.ShapeDtypeStruct((N, 2, HW), jnp.float32),
                   jax.ShapeDtypeStruct((N, n_fine, HW), jnp.float32)),
        grid_spec=pltpu.PrefetchScalarGridSpec(
            num_scalar_prefetch=0,
            grid=(N,),                                              # batch axis; 'parallel' -> megacore split
            in_specs=[
                pl.BlockSpec((1, C, HW), lambda n: (n, 0, 0)),              # x
                pl.BlockSpec((2, 2 * HW), lambda n: (0, 0)),                # (row, col) coords
                pl.BlockSpec((C, 1), lambda n: (0, 0)),                     # BN fg scale
                pl.BlockSpec((C, 1), lambda n: (0, 0)),                     # BN fg shift
                pl.BlockSpec((C, 1), lambda n: (0, 0)),                     # BN bg scale
                pl.BlockSpec((C, 1), lambda n: (0, 0)),                     # BN bg shift
                pl.BlockSpec((n_fine, 9 * C), lambda n: (0, 0)),            # folded fg head taps
                pl.BlockSpec((1, 9 * C), lambda n: (0, 0)),                 # folded bg head taps
                pl.BlockSpec((1, 1), lambda n: (0, 0)),                     # folded fg bias
                pl.BlockSpec((1, 1), lambda n: (0, 0)),                     # folded bg bias
                pl.BlockSpec((n_fine - 1, 1), lambda n: (0, 0)),            # folded fine bias
                pl.BlockSpec((n_fine - 1, 1), lambda n: (0, 0)),            # feat2feat weight on fg_logit
            ],
            out_specs=[
                pl.BlockSpec((1, 2, HW), lambda n: (n, 0, 0)),              # coarse (lane-dense)
                pl.BlockSpec((1, n_fine, HW), lambda n: (n, 0, 0)),         # fine   (lane-dense)
            ],
            scratch_shapes=[pltpu.VMEM((9 * C, 2 * HW), jnp.float32)],      # stacked shifted taps
        ),
        compiler_params=pltpu.CompilerParams(dimension_semantics=("parallel",)),
    )
    coarse_flat, fine_flat = kernel(x_in, coords, s_fg, t_fg, s_bg, t_bg,
                                    wfg_fold, wbg_fold, bfg_fold, bbg_fold,
                                    bfine_fold, wffl)
    # (N, n_cls, H*W) -> NCHW: pure reshape, no transpose.
    return (coarse_flat.reshape(N, 2, H, W),
            fine_flat.reshape(N, n_fine, H, W))


def reference_forward(x_nchw, params, n_fine, eps=1e-5):
    """Pure-JAX reference of the same math for a correctness check."""
    (w3, b3, wfg, bfg, wbg, bbg, wff, bff, g_fg, be_fg, g_bg, be_bg) = params
    x = jnp.transpose(x_nchw, (0, 2, 3, 1)).astype(jnp.float32)     # NHWC
    mean = jnp.mean(x, axis=(0, 1, 2))
    var = jnp.mean((x - mean) ** 2, axis=(0, 1, 2))
    xn = (x - mean) / jnp.sqrt(var + eps)
    xr_fg = jnp.maximum(xn * g_fg + be_fg, 0.0)
    xr_bg = jnp.maximum(xn * g_bg + be_bg, 0.0)

    def conv(z):
        return jax.lax.conv_general_dilated(
            z, w3, (1, 1), 'SAME',
            dimension_numbers=('NHWC', 'HWIO', 'NHWC')) + b3

    feat_fg = conv(xr_fg)
    feat_bg = conv(xr_bg)
    fg_logit = feat_fg @ wfg.T + bfg
    bg_logit = feat_bg @ wbg.T + bbg
    fine_split = jnp.concatenate([feat_fg, fg_logit], -1) @ wff.T + bff
    coarse = jnp.concatenate([bg_logit, fg_logit], -1)
    fine = jnp.concatenate([bg_logit, fine_split], -1)
    return (jnp.transpose(coarse, (0, 3, 1, 2)),
            jnp.transpose(fine, (0, 3, 1, 2)))


if __name__ == "__main__":
    key = jax.random.PRNGKey(0)
    kx, kp = jax.random.split(key)

    N, C, H, W = 2, 4, 16, 16          # in_chns=4
    n_coarse, n_fine = 2, 3            # n_coarse unused in this branch (as in PyTorch)

    x = jax.random.normal(kx, (N, C, H, W), jnp.float32)
    params = init_params(kp, C, n_fine)

    coarse, fine = classifier_forward(x, params, n_fine=n_fine)
    jax.block_until_ready((coarse, fine))

    assert coarse.shape == (N, 2, H, W) and fine.shape == (N, n_fine, H, W)
    c_ref, f_ref = reference_forward(x, params, n_fine)
    np.testing.assert_allclose(np.asarray(coarse), np.asarray(c_ref), rtol=1e-4, atol=1e-4)
    np.testing.assert_allclose(np.asarray(fine), np.asarray(f_ref), rtol=1e-4, atol=1e-4)

    print("KERNEL_OK")
</pallas_src>

<mosaic_0001>
module attributes {stable_mosaic.version = 11 : i64} {
  func.func @_classifier_kernel(%arg0: i32, %arg1: memref<1x4x256xf32, #tpu.memory_space<vmem>>, %arg2: memref<2x512xi32, #tpu.memory_space<vmem>>, %arg3: memref<4x1xf32, #tpu.memory_space<vmem>>, %arg4: memref<4x1xf32, #tpu.memory_space<vmem>>, %arg5: memref<4x1xf32, #tpu.memory_space<vmem>>, %arg6: memref<4x1xf32, #tpu.memory_space<vmem>>, %arg7: memref<3x36xf32, #tpu.memory_space<vmem>>, %arg8: memref<1x36xf32, #tpu.memory_space<vmem>>, %arg9: memref<1x1xf32, #tpu.memory_space<vmem>>, %arg10: memref<1x1xf32, #tpu.memory_space<vmem>>, %arg11: memref<2x1xf32, #tpu.memory_space<vmem>>, %arg12: memref<2x1xf32, #tpu.memory_space<vmem>>, %arg13: memref<1x2x256xf32, #tpu.memory_space<vmem>>, %arg14: memref<1x3x256xf32, #tpu.memory_space<vmem>>, %arg15: memref<36x512xf32, #tpu.memory_space<vmem>>) attributes {dimension_semantics = [#tpu.dimension_semantics<parallel>], iteration_bounds = array<i64: 2>, scalar_prefetch = 0 : i64, scratch_operands = 1 : i64, tpu.core_type = #tpu.core_type<tc>, window_params = [{transform_indices = @transform_0, window_bounds = array<i64: 1, 4, 256>}, {pipeline_mode = #tpu.pipeline_mode<synchronous>, transform_indices = @transform_1, window_bounds = array<i64: 2, 512>}, {pipeline_mode = #tpu.pipeline_mode<synchronous>, transform_indices = @transform_2, window_bounds = array<i64: 4, 1>}, {pipeline_mode = #tpu.pipeline_mode<synchronous>, transform_indices = @transform_3, window_bounds = array<i64: 4, 1>}, {pipeline_mode = #tpu.pipeline_mode<synchronous>, transform_indices = @transform_4, window_bounds = array<i64: 4, 1>}, {pipeline_mode = #tpu.pipeline_mode<synchronous>, transform_indices = @transform_5, window_bounds = array<i64: 4, 1>}, {pipeline_mode = #tpu.pipeline_mode<synchronous>, transform_indices = @transform_6, window_bounds = array<i64: 3, 36>}, {pipeline_mode = #tpu.pipeline_mode<synchronous>, transform_indices = @transform_7, window_bounds = array<i64: 1, 36>}, {pipeline_mode = #tpu.pipeline_mode<synchronous>, transform_indices = @transform_8, window_bounds = array<i64: 1, 1>}, {pipeline_mode = #tpu.pipeline_mode<synchronous>, transform_indices = @transform_9, window_bounds = array<i64: 1, 1>}, {pipeline_mode = #tpu.pipeline_mode<synchronous>, transform_indices = @transform_10, window_bounds = array<i64: 2, 1>}, {pipeline_mode = #tpu.pipeline_mode<synchronous>, transform_indices = @transform_11, window_bounds = array<i64: 2, 1>}, {transform_indices = @transform_12, window_bounds = array<i64: 1, 2, 256>}, {transform_indices = @transform_13, window_bounds = array<i64: 1, 3, 256>}]} {
    %c0 = arith.constant 0 : index
    %c0_0 = arith.constant 0 : index
    %c0_1 = arith.constant 0 : index
    %0 = vector.load %arg1[%c0, %c0_0, %c0_1] : memref<1x4x256xf32, #tpu.memory_space<vmem>>, vector<1x4x256xf32>
    %1 = vector.shape_cast %0 : vector<1x4x256xf32> to vector<4x256xf32>
    %c0_2 = arith.constant 0 : index
    %c0_3 = arith.constant 0 : index
    %2 = vector.load %arg3[%c0_2, %c0_3] : memref<4x1xf32, #tpu.memory_space<vmem>>, vector<4x1xf32>
    %3 = vector.broadcast %2 : vector<4x1xf32> to vector<4x256xf32>
    %4 = arith.mulf %1, %3 : vector<4x256xf32>
    %c0_4 = arith.constant 0 : index
    %c0_5 = arith.constant 0 : index
    %5 = vector.load %arg4[%c0_4, %c0_5] : memref<4x1xf32, #tpu.memory_space<vmem>>, vector<4x1xf32>
    %6 = vector.broadcast %5 : vector<4x1xf32> to vector<4x256xf32>
    %7 = arith.addf %4, %6 : vector<4x256xf32>
    %cst = arith.constant 0.000000e+00 : f32
    %8 = vector.broadcast %cst : f32 to vector<4x256xf32>
    %9 = arith.maximumf %7, %8 : vector<4x256xf32>
    %c0_6 = arith.constant 0 : index
    %c0_7 = arith.constant 0 : index
    %10 = vector.load %arg5[%c0_6, %c0_7] : memref<4x1xf32, #tpu.memory_space<vmem>>, vector<4x1xf32>
    %11 = vector.broadcast %10 : vector<4x1xf32> to vector<4x256xf32>
    %12 = arith.mulf %1, %11 : vector<4x256xf32>
    %c0_8 = arith.constant 0 : index
    %c0_9 = arith.constant 0 : index
    %13 = vector.load %arg6[%c0_8, %c0_9] : memref<4x1xf32, #tpu.memory_space<vmem>>, vector<4x1xf32>
    %14 = vector.broadcast %13 : vector<4x1xf32> to vector<4x256xf32>
    %15 = arith.addf %12, %14 : vector<4x256xf32>
    %cst_10 = arith.constant 0.000000e+00 : f32
    %16 = vector.broadcast %cst_10 : f32 to vector<4x256xf32>
    %17 = arith.maximumf %15, %16 : vector<4x256xf32>
    %18 = tpu.concatenate %9, %17 in 1 : vector<4x256xf32>, vector<4x256xf32> -> vector<4x512xf32>
    %c0_11 = arith.constant 0 : index
    %c0_12 = arith.constant 0 : index
    %19 = vector.load %arg2[%c0_11, %c0_12] : memref<2x512xi32, #tpu.memory_space<vmem>>, vector<1x512xi32>
    %c1 = arith.constant 1 : index
    %c0_13 = arith.constant 0 : index
    %20 = vector.load %arg2[%c1, %c0_13] : memref<2x512xi32, #tpu.memory_space<vmem>>, vector<1x512xi32>
    %c17_i32 = arith.constant 17 : i32
    %21 = tpu.dynamic_rotate %18 by %c17_i32 dim 1 : vector<4x512xf32>, i32 -> vector<4x512xf32>
    %c-1_i32 = arith.constant -1 : i32
    %22 = vector.broadcast %c-1_i32 : i32 to vector<1x512xi32>
    %23 = arith.addi %19, %22 : vector<1x512xi32>
    %c0_i32 = arith.constant 0 : i32
    %24 = vector.broadcast %c0_i32 : i32 to vector<1x512xi32>
    %25 = arith.cmpi sge, %23, %24 : vector<1x512xi32>
    %c-1_i32_14 = arith.constant -1 : i32
    %26 = vector.broadcast %c-1_i32_14 : i32 to vector<1x512xi32>
    %27 = arith.addi %19, %26 : vector<1x512xi32>
    %c16_i32 = arith.constant 16 : i32
    %28 = vector.broadcast %c16_i32 : i32 to vector<1x512xi32>
    %29 = arith.cmpi slt, %27, %28 : vector<1x512xi32>
    %30 = arith.andi %25, %29 : vector<1x512xi1>
    %c-1_i32_15 = arith.constant -1 : i32
    %31 = vector.broadcast %c-1_i32_15 : i32 to vector<1x512xi32>
    %32 = arith.addi %20, %31 : vector<1x512xi32>
    %c0_i32_16 = arith.constant 0 : i32
    %33 = vector.broadcast %c0_i32_16 : i32 to vector<1x512xi32>
    %34 = arith.cmpi sge, %32, %33 : vector<1x512xi32>
    %35 = arith.andi %30, %34 : vector<1x512xi1>
    %c-1_i32_17 = arith.constant -1 : i32
    %36 = vector.broadcast %c-1_i32_17 : i32 to vector<1x512xi32>
    %37 = arith.addi %20, %36 : vector<1x512xi32>
    %c16_i32_18 = arith.constant 16 : i32
    %38 = vector.broadcast %c16_i32_18 : i32 to vector<1x512xi32>
    %39 = arith.cmpi slt, %37, %38 : vector<1x512xi32>
    %40 = arith.andi %35, %39 : vector<1x512xi1>
    %41 = arith.extui %40 : vector<1x512xi1> to vector<1x512xi32>
    %42 = arith.sitofp %41 : vector<1x512xi32> to vector<1x512xf32>
    %43 = vector.broadcast %42 : vector<1x512xf32> to vector<4x512xf32>
    %44 = arith.mulf %21, %43 : vector<4x512xf32>
    %c0_19 = arith.constant 0 : index
    %c0_20 = arith.constant 0 : index
    %45 = vector.load %arg15[%c0_19, %c0_20] : memref<36x512xf32, #tpu.memory_space<vmem>>, vector<4x512xf32>
    tpu.vector_store %arg15[%c0_19, %c0_20], %44 {strides = array<i32>} : memref<36x512xf32, #tpu.memory_space<vmem>>, vector<4x512xf32>,
    %c16_i32_21 = arith.constant 16 : i32
    %46 = tpu.dynamic_rotate %18 by %c16_i32_21 dim 1 : vector<4x512xf32>, i32 -> vector<4x512xf32>
    %c-1_i32_22 = arith.constant -1 : i32
    %47 = vector.broadcast %c-1_i32_22 : i32 to vector<1x512xi32>
    %48 = arith.addi %19, %47 : vector<1x512xi32>
    %c0_i32_23 = arith.constant 0 : i32
    %49 = vector.broadcast %c0_i32_23 : i32 to vector<1x512xi32>
    %50 = arith.cmpi sge, %48, %49 : vector<1x512xi32>
    %c-1_i32_24 = arith.constant -1 : i32
    %51 = vector.broadcast %c-1_i32_24 : i32 to vector<1x512xi32>
    %52 = arith.addi %19, %51 : vector<1x512xi32>
    %c16_i32_25 = arith.constant 16 : i32
    %53 = vector.broadcast %c16_i32_25 : i32 to vector<1x512xi32>
    %54 = arith.cmpi slt, %52, %53 : vector<1x512xi32>
    %55 = arith.andi %50, %54 : vector<1x512xi1>
    %c0_i32_26 = arith.constant 0 : i32
    %56 = vector.broadcast %c0_i32_26 : i32 to vector<1x512xi32>
    %57 = arith.addi %20, %56 : vector<1x512xi32>
    %c0_i32_27 = arith.constant 0 : i32
    %58 = vector.broadcast %c0_i32_27 : i32 to vector<1x512xi32>
    %59 = arith.cmpi sge, %57, %58 : vector<1x512xi32>
    %60 = arith.andi %55, %59 : vector<1x512xi1>
    %c0_i32_28 = arith.constant 0 : i32
    %61 = vector.broadcast %c0_i32_28 : i32 to vector<1x512xi32>
    %62 = arith.addi %20, %61 : vector<1x512xi32>
    %c16_i32_29 = arith.constant 16 : i32
    %63 = vector.broadcast %c16_i32_29 : i32 to vector<1x512xi32>
    %64 = arith.cmpi slt, %62, %63 : vector<1x512xi32>
    %65 = arith.andi %60, %64 : vector<1x512xi1>
    %66 = arith.extui %65 : vector<1x512xi1> to vector<1x512xi32>
    %67 = arith.sitofp %66 : vector<1x512xi32> to vector<1x512xf32>
    %68 = vector.broadcast %67 : vector<1x512xf32> to vector<4x512xf32>
    %69 = arith.mulf %46, %68 : vector<4x512xf32>
    %c4 = arith.constant 4 : index
    %c0_30 = arith.constant 0 : index
    %70 = vector.load %arg15[%c4, %c0_30] : memref<36x512xf32, #tpu.memory_space<vmem>>, vector<4x512xf32>
    tpu.vector_store %arg15[%c4, %c0_30], %69 {strides = array<i32>} : memref<36x512xf32, #tpu.memory_space<vmem>>, vector<4x512xf32>,
    %c15_i32 = arith.constant 15 : i32
    %71 = tpu.dynamic_rotate %18 by %c15_i32 dim 1 : vector<4x512xf32>, i32 -> vector<4x512xf32>
    %c-1_i32_31 = arith.constant -1 : i32
    %72 = vector.broadcast %c-1_i32_31 : i32 to vector<1x512xi32>
    %73 = arith.addi %19, %72 : vector<1x512xi32>
    %c0_i32_32 = arith.constant 0 : i32
    %74 = vector.broadcast %c0_i32_32 : i32 to vector<1x512xi32>
    %75 = arith.cmpi sge, %73, %74 : vector<1x512xi32>
    %c-1_i32_33 = arith.constant -1 : i32
    %76 = vector.broadcast %c-1_i32_33 : i32 to vector<1x512xi32>
    %77 = arith.addi %19, %76 : vector<1x512xi32>
    %c16_i32_34 = arith.constant 16 : i32
    %78 = vector.broadcast %c16_i32_34 : i32 to vector<1x512xi32>
    %79 = arith.cmpi slt, %77, %78 : vector<1x512xi32>
    %80 = arith.andi %75, %79 : vector<1x512xi1>
    %c1_i32 = arith.constant 1 : i32
    %81 = vector.broadcast %c1_i32 : i32 to vector<1x512xi32>
    %82 = arith.addi %20, %81 : vector<1x512xi32>
    %c0_i32_35 = arith.constant 0 : i32
    %83 = vector.broadcast %c0_i32_35 : i32 to vector<1x512xi32>
    %84 = arith.cmpi sge, %82, %83 : vector<1x512xi32>
    %85 = arith.andi %80, %84 : vector<1x512xi1>
    %c1_i32_36 = arith.constant 1 : i32
    %86 = vector.broadcast %c1_i32_36 : i32 to vector<1x512xi32>
    %87 = arith.addi %20, %86 : vector<1x512xi32>
    %c16_i32_37 = arith.constant 16 : i32
    %88 = vector.broadcast %c16_i32_37 : i32 to vector<1x512xi32>
    %89 = arith.cmpi slt, %87, %88 : vector<1x512xi32>
    %90 = arith.andi %85, %89 : vector<1x512xi1>
    %91 = arith.extui %90 : vector<1x512xi1> to vector<1x512xi32>
    %92 = arith.sitofp %91 : vector<1x512xi32> to vector<1x512xf32>
    %93 = vector.broadcast %92 : vector<1x512xf32> to vector<4x512xf32>
    %94 = arith.mulf %71, %93 : vector<4x512xf32>
    %c8 = arith.constant 8 : index
    %c0_38 = arith.constant 0 : index
    %95 = vector.load %arg15[%c8, %c0_38] : memref<36x512xf32, #tpu.memory_space<vmem>>, vector<4x512xf32>
    tpu.vector_store %arg15[%c8, %c0_38], %94 {strides = array<i32>} : memref<36x512xf32, #tpu.memory_space<vmem>>, vector<4x512xf32>,
    %c1_i32_39 = arith.constant 1 : i32
    %96 = tpu.dynamic_rotate %18 by %c1_i32_39 dim 1 : vector<4x512xf32>, i32 -> vector<4x512xf32>
    %c0_i32_40 = arith.constant 0 : i32
    %97 = vector.broadcast %c0_i32_40 : i32 to vector<1x512xi32>
    %98 = arith.addi %19, %97 : vector<1x512xi32>
    %c0_i32_41 = arith.constant 0 : i32
    %99 = vector.broadcast %c0_i32_41 : i32 to vector<1x512xi32>
    %100 = arith.cmpi sge, %98, %99 : vector<1x512xi32>
    %c0_i32_42 = arith.constant 0 : i32
    %101 = vector.broadcast %c0_i32_42 : i32 to vector<1x512xi32>
    %102 = arith.addi %19, %101 : vector<1x512xi32>
    %c16_i32_43 = arith.constant 16 : i32
    %103 = vector.broadcast %c16_i32_43 : i32 to vector<1x512xi32>
    %104 = arith.cmpi slt, %102, %103 : vector<1x512xi32>
    %105 = arith.andi %100, %104 : vector<1x512xi1>
    %c-1_i32_44 = arith.constant -1 : i32
    %106 = vector.broadcast %c-1_i32_44 : i32 to vector<1x512xi32>
    %107 = arith.addi %20, %106 : vector<1x512xi32>
    %c0_i32_45 = arith.constant 0 : i32
    %108 = vector.broadcast %c0_i32_45 : i32 to vector<1x512xi32>
    %109 = arith.cmpi sge, %107, %108 : vector<1x512xi32>
    %110 = arith.andi %105, %109 : vector<1x512xi1>
    %c-1_i32_46 = arith.constant -1 : i32
    %111 = vector.broadcast %c-1_i32_46 : i32 to vector<1x512xi32>
    %112 = arith.addi %20, %111 : vector<1x512xi32>
    %c16_i32_47 = arith.constant 16 : i32
    %113 = vector.broadcast %c16_i32_47 : i32 to vector<1x512xi32>
    %114 = arith.cmpi slt, %112, %113 : vector<1x512xi32>
    %115 = arith.andi %110, %114 : vector<1x512xi1>
    %116 = arith.extui %115 : vector<1x512xi1> to vector<1x512xi32>
    %117 = arith.sitofp %116 : vector<1x512xi32> to vector<1x512xf32>
    %118 = vector.broadcast %117 : vector<1x512xf32> to vector<4x512xf32>
    %119 = arith.mulf %96, %118 : vector<4x512xf32>
    %c12 = arith.constant 12 : index
    %c0_48 = arith.constant 0 : index
    %120 = vector.load %arg15[%c12, %c0_48] : memref<36x512xf32, #tpu.memory_space<vmem>>, vector<4x512xf32>
    tpu.vector_store %arg15[%c12, %c0_48], %119 {strides = array<i32>} : memref<36x512xf32, #tpu.memory_space<vmem>>, vector<4x512xf32>,
    %c16 = arith.constant 16 : index
    %c0_49 = arith.constant 0 : index
    %121 = vector.load %arg15[%c16, %c0_49] : memref<36x512xf32, #tpu.memory_space<vmem>>, vector<4x512xf32>
    tpu.vector_store %arg15[%c16, %c0_49], %18 {strides = array<i32>} : memref<36x512xf32, #tpu.memory_space<vmem>>, vector<4x512xf32>,
    %c511_i32 = arith.constant 511 : i32
    %122 = tpu.dynamic_rotate %18 by %c511_i32 dim 1 : vector<4x512xf32>, i32 -> vector<4x512xf32>
    %c0_i32_50 = arith.constant 0 : i32
    %123 = vector.broadcast %c0_i32_50 : i32 to vector<1x512xi32>
    %124 = arith.addi %19, %123 : vector<1x512xi32>
    %c0_i32_51 = arith.constant 0 : i32
    %125 = vector.broadcast %c0_i32_51 : i32 to vector<1x512xi32>
    %126 = arith.cmpi sge, %124, %125 : vector<1x512xi32>
    %c0_i32_52 = arith.constant 0 : i32
    %127 = vector.broadcast %c0_i32_52 : i32 to vector<1x512xi32>
    %128 = arith.addi %19, %127 : vector<1x512xi32>
    %c16_i32_53 = arith.constant 16 : i32
    %129 = vector.broadcast %c16_i32_53 : i32 to vector<1x512xi32>
    %130 = arith.cmpi slt, %128, %129 : vector<1x512xi32>
    %131 = arith.andi %126, %130 : vector<1x512xi1>
    %c1_i32_54 = arith.constant 1 : i32
    %132 = vector.broadcast %c1_i32_54 : i32 to vector<1x512xi32>
    %133 = arith.addi %20, %132 : vector<1x512xi32>
    %c0_i32_55 = arith.constant 0 : i32
    %134 = vector.broadcast %c0_i32_55 : i32 to vector<1x512xi32>
    %135 = arith.cmpi sge, %133, %134 : vector<1x512xi32>
    %136 = arith.andi %131, %135 : vector<1x512xi1>
    %c1_i32_56 = arith.constant 1 : i32
    %137 = vector.broadcast %c1_i32_56 : i32 to vector<1x512xi32>
    %138 = arith.addi %20, %137 : vector<1x512xi32>
    %c16_i32_57 = arith.constant 16 : i32
    %139 = vector.broadcast %c16_i32_57 : i32 to vector<1x512xi32>
    %140 = arith.cmpi slt, %138, %139 : vector<1x512xi32>
    %141 = arith.andi %136, %140 : vector<1x512xi1>
    %142 = arith.extui %141 : vector<1x512xi1> to vector<1x512xi32>
    %143 = arith.sitofp %142 : vector<1x512xi32> to vector<1x512xf32>
    %144 = vector.broadcast %143 : vector<1x512xf32> to vector<4x512xf32>
    %145 = arith.mulf %122, %144 : vector<4x512xf32>
    %c20 = arith.constant 20 : index
    %c0_58 = arith.constant 0 : index
    %146 = vector.load %arg15[%c20, %c0_58] : memref<36x512xf32, #tpu.memory_space<vmem>>, vector<4x512xf32>
    tpu.vector_store %arg15[%c20, %c0_58], %145 {strides = array<i32>} : memref<36x512xf32, #tpu.memory_space<vmem>>, vector<4x512xf32>,
    %c497_i32 = arith.constant 497 : i32
    %147 = tpu.dynamic_rotate %18 by %c497_i32 dim 1 : vector<4x512xf32>, i32 -> vector<4x512xf32>
    %c1_i32_59 = arith.constant 1 : i32
    %148 = vector.broadcast %c1_i32_59 : i32 to vector<1x512xi32>
    %149 = arith.addi %19, %148 : vector<1x512xi32>
    %c0_i32_60 = arith.constant 0 : i32
    %150 = vector.broadcast %c0_i32_60 : i32 to vector<1x512xi32>
    %151 = arith.cmpi sge, %149, %150 : vector<1x512xi32>
    %c1_i32_61 = arith.constant 1 : i32
    %152 = vector.broadcast %c1_i32_61 : i32 to vector<1x512xi32>
    %153 = arith.addi %19, %152 : vector<1x512xi32>
    %c16_i32_62 = arith.constant 16 : i32
    %154 = vector.broadcast %c16_i32_62 : i32 to vector<1x512xi32>
    %155 = arith.cmpi slt, %153, %154 : vector<1x512xi32>
    %156 = arith.andi %151, %155 : vector<1x512xi1>
    %c-1_i32_63 = arith.constant -1 : i32
    %157 = vector.broadcast %c-1_i32_63 : i32 to vector<1x512xi32>
    %158 = arith.addi %20, %157 : vector<1x512xi32>
    %c0_i32_64 = arith.constant 0 : i32
    %159 = vector.broadcast %c0_i32_64 : i32 to vector<1x512xi32>
    %160 = arith.cmpi sge, %158, %159 : vector<1x512xi32>
    %161 = arith.andi %156, %160 : vector<1x512xi1>
    %c-1_i32_65 = arith.constant -1 : i32
    %162 = vector.broadcast %c-1_i32_65 : i32 to vector<1x512xi32>
    %163 = arith.addi %20, %162 : vector<1x512xi32>
    %c16_i32_66 = arith.constant 16 : i32
    %164 = vector.broadcast %c16_i32_66 : i32 to vector<1x512xi32>
    %165 = arith.cmpi slt, %163, %164 : vector<1x512xi32>
    %166 = arith.andi %161, %165 : vector<1x512xi1>
    %167 = arith.extui %166 : vector<1x512xi1> to vector<1x512xi32>
    %168 = arith.sitofp %167 : vector<1x512xi32> to vector<1x512xf32>
    %169 = vector.broadcast %168 : vector<1x512xf32> to vector<4x512xf32>
    %170 = arith.mulf %147, %169 : vector<4x512xf32>
    %c24 = arith.constant 24 : index
    %c0_67 = arith.constant 0 : index
    %171 = vector.load %arg15[%c24, %c0_67] : memref<36x512xf32, #tpu.memory_space<vmem>>, vector<4x512xf32>
    tpu.vector_store %arg15[%c24, %c0_67], %170 {strides = array<i32>} : memref<36x512xf32, #tpu.memory_space<vmem>>, vector<4x512xf32>,
    %c496_i32 = arith.constant 496 : i32
    %172 = tpu.dynamic_rotate %18 by %c496_i32 dim 1 : vector<4x512xf32>, i32 -> vector<4x512xf32>
    %c1_i32_68 = arith.constant 1 : i32
    %173 = vector.broadcast %c1_i32_68 : i32 to vector<1x512xi32>
    %174 = arith.addi %19, %173 : vector<1x512xi32>
    %c0_i32_69 = arith.constant 0 : i32
    %175 = vector.broadcast %c0_i32_69 : i32 to vector<1x512xi32>
    %176 = arith.cmpi sge, %174, %175 : vector<1x512xi32>
    %c1_i32_70 = arith.constant 1 : i32
    %177 = vector.broadcast %c1_i32_70 : i32 to vector<1x512xi32>
    %178 = arith.addi %19, %177 : vector<1x512xi32>
    %c16_i32_71 = arith.constant 16 : i32
    %179 = vector.broadcast %c16_i32_71 : i32 to vector<1x512xi32>
    %180 = arith.cmpi slt, %178, %179 : vector<1x512xi32>
    %181 = arith.andi %176, %180 : vector<1x512xi1>
    %c0_i32_72 = arith.constant 0 : i32
    %182 = vector.broadcast %c0_i32_72 : i32 to vector<1x512xi32>
    %183 = arith.addi %20, %182 : vector<1x512xi32>
    %c0_i32_73 = arith.constant 0 : i32
    %184 = vector.broadcast %c0_i32_73 : i32 to vector<1x512xi32>
    %185 = arith.cmpi sge, %183, %184 : vector<1x512xi32>
    %186 = arith.andi %181, %185 : vector<1x512xi1>
    %c0_i32_74 = arith.constant 0 : i32
    %187 = vector.broadcast %c0_i32_74 : i32 to vector<1x512xi32>
    %188 = arith.addi %20, %187 : vector<1x512xi32>
    %c16_i32_75 = arith.constant 16 : i32
    %189 = vector.broadcast %c16_i32_75 : i32 to vector<1x512xi32>
    %190 = arith.cmpi slt, %188, %189 : vector<1x512xi32>
    %191 = arith.andi %186, %190 : vector<1x512xi1>
    %192 = arith.extui %191 : vector<1x512xi1> to vector<1x512xi32>
    %193 = arith.sitofp %192 : vector<1x512xi32> to vector<1x512xf32>
    %194 = vector.broadcast %193 : vector<1x512xf32> to vector<4x512xf32>
    %195 = arith.mulf %172, %194 : vector<4x512xf32>
    %c28 = arith.constant 28 : index
    %c0_76 = arith.constant 0 : index
    %196 = vector.load %arg15[%c28, %c0_76] : memref<36x512xf32, #tpu.memory_space<vmem>>, vector<4x512xf32>
    tpu.vector_store %arg15[%c28, %c0_76], %195 {strides = array<i32>} : memref<36x512xf32, #tpu.memory_space<vmem>>, vector<4x512xf32>,
    %c495_i32 = arith.constant 495 : i32
    %197 = tpu.dynamic_rotate %18 by %c495_i32 dim 1 : vector<4x512xf32>, i32 -> vector<4x512xf32>
    %c1_i32_77 = arith.constant 1 : i32
    %198 = vector.broadcast %c1_i32_77 : i32 to vector<1x512xi32>
    %199 = arith.addi %19, %198 : vector<1x512xi32>
    %c0_i32_78 = arith.constant 0 : i32
    %200 = vector.broadcast %c0_i32_78 : i32 to vector<1x512xi32>
    %201 = arith.cmpi sge, %199, %200 : vector<1x512xi32>
    %c1_i32_79 = arith.constant 1 : i32
    %202 = vector.broadcast %c1_i32_79 : i32 to vector<1x512xi32>
    %203 = arith.addi %19, %202 : vector<1x512xi32>
    %c16_i32_80 = arith.constant 16 : i32
    %204 = vector.broadcast %c16_i32_80 : i32 to vector<1x512xi32>
    %205 = arith.cmpi slt, %203, %204 : vector<1x512xi32>
    %206 = arith.andi %201, %205 : vector<1x512xi1>
    %c1_i32_81 = arith.constant 1 : i32
    %207 = vector.broadcast %c1_i32_81 : i32 to vector<1x512xi32>
    %208 = arith.addi %20, %207 : vector<1x512xi32>
    %c0_i32_82 = arith.constant 0 : i32
    %209 = vector.broadcast %c0_i32_82 : i32 to vector<1x512xi32>
    %210 = arith.cmpi sge, %208, %209 : vector<1x512xi32>
    %211 = arith.andi %206, %210 : vector<1x512xi1>
    %c1_i32_83 = arith.constant 1 : i32
    %212 = vector.broadcast %c1_i32_83 : i32 to vector<1x512xi32>
    %213 = arith.addi %20, %212 : vector<1x512xi32>
    %c16_i32_84 = arith.constant 16 : i32
    %214 = vector.broadcast %c16_i32_84 : i32 to vector<1x512xi32>
    %215 = arith.cmpi slt, %213, %214 : vector<1x512xi32>
    %216 = arith.andi %211, %215 : vector<1x512xi1>
    %217 = arith.extui %216 : vector<1x512xi1> to vector<1x512xi32>
    %218 = arith.sitofp %217 : vector<1x512xi32> to vector<1x512xf32>
    %219 = vector.broadcast %218 : vector<1x512xf32> to vector<4x512xf32>
    %220 = arith.mulf %197, %219 : vector<4x512xf32>
    %c32 = arith.constant 32 : index
    %c0_85 = arith.constant 0 : index
    %221 = vector.load %arg15[%c32, %c0_85] : memref<36x512xf32, #tpu.memory_space<vmem>>, vector<4x512xf32>
    tpu.vector_store %arg15[%c32, %c0_85], %220 {strides = array<i32>} : memref<36x512xf32, #tpu.memory_space<vmem>>, vector<4x512xf32>,
    %c0_86 = arith.constant 0 : index
    %c0_87 = arith.constant 0 : index
    %222 = vector.load %arg7[%c0_86, %c0_87] : memref<3x36xf32, #tpu.memory_space<vmem>>, vector<3x36xf32>
    %c0_88 = arith.constant 0 : index
    %c0_89 = arith.constant 0 : index
    %223 = vector.load %arg15[%c0_88, %c0_89] : memref<36x512xf32, #tpu.memory_space<vmem>>, vector<36x256xf32>
    %cst_90 = arith.constant dense<0.000000e+00> : vector<3x256xf32>
    %224 = tpu.matmul %222, %223, %cst_90 {dimension_numbers = #tpu.dot_dimension_numbers<[1], [0], [0], [1], [0, 0, 1, 1], [], []>} : vector<3x36xf32>, vector<36x256xf32>, vector<3x256xf32> -> vector<3x256xf32>
    %c0_91 = arith.constant 0 : index
    %c0_92 = arith.constant 0 : index
    %225 = vector.load %arg8[%c0_91, %c0_92] : memref<1x36xf32, #tpu.memory_space<vmem>>, vector<1x36xf32>
    %c0_93 = arith.constant 0 : index
    %c256 = arith.constant 256 : index
    %226 = vector.load %arg15[%c0_93, %c256] : memref<36x512xf32, #tpu.memory_space<vmem>>, vector<36x256xf32>
    %cst_94 = arith.constant dense<0.000000e+00> : vector<1x256xf32>
    %227 = tpu.matmul %225, %226, %cst_94 {dimension_numbers = #tpu.dot_dimension_numbers<[1], [0], [0], [1], [0, 0, 1, 1], [], []>} : vector<1x36xf32>, vector<36x256xf32>, vector<1x256xf32> -> vector<1x256xf32>
    %c0_95 = arith.constant 0 : index
    %c0_96 = arith.constant 0 : index
    %228 = vector.load %arg10[%c0_95, %c0_96] : memref<1x1xf32, #tpu.memory_space<vmem>>, vector<1x1xf32>
    %229 = vector.broadcast %228 : vector<1x1xf32> to vector<1x256xf32>
    %230 = arith.addf %227, %229 : vector<1x256xf32>
    %231 = vector.extract_strided_slice %224 {offsets = [0, 0], sizes = [1, 256], strides = [1, 1]} : vector<3x256xf32> to vector<1x256xf32>
    %c0_97 = arith.constant 0 : index
    %c0_98 = arith.constant 0 : index
    %232 = vector.load %arg9[%c0_97, %c0_98] : memref<1x1xf32, #tpu.memory_space<vmem>>, vector<1x1xf32>
    %233 = vector.broadcast %232 : vector<1x1xf32> to vector<1x256xf32>
    %234 = arith.addf %231, %233 : vector<1x256xf32>
    %235 = vector.extract_strided_slice %224 {offsets = [1, 0], sizes = [2, 256], strides = [1, 1]} : vector<3x256xf32> to vector<2x256xf32>
    %c0_99 = arith.constant 0 : index
    %c0_100 = arith.constant 0 : index
    %236 = vector.load %arg12[%c0_99, %c0_100] : memref<2x1xf32, #tpu.memory_space<vmem>>, vector<2x1xf32>
    %237 = vector.broadcast %236 : vector<2x1xf32> to vector<2x256xf32>
    %238 = vector.broadcast %234 : vector<1x256xf32> to vector<2x256xf32>
    %239 = arith.mulf %237, %238 : vector<2x256xf32>
    %240 = arith.addf %235, %239 : vector<2x256xf32>
    %c0_101 = arith.constant 0 : index
    %c0_102 = arith.constant 0 : index
    %241 = vector.load %arg11[%c0_101, %c0_102] : memref<2x1xf32, #tpu.memory_space<vmem>>, vector<2x1xf32>
    %242 = vector.broadcast %241 : vector<2x1xf32> to vector<2x256xf32>
    %243 = arith.addf %240, %242 : vector<2x256xf32>
    %244 = tpu.concatenate %230, %234 in 0 : vector<1x256xf32>, vector<1x256xf32> -> vector<2x256xf32>
    %c0_103 = arith.constant 0 : index
    %c0_104 = arith.constant 0 : index
    %c0_105 = arith.constant 0 : index
    %245 = vector.load %arg13[%c0_103, %c0_104, %c0_105] : memref<1x2x256xf32, #tpu.memory_space<vmem>>, vector<1x2x256xf32>
    %246 = vector.shape_cast %245 : vector<1x2x256xf32> to vector<2x256xf32>
    %247 = vector.shape_cast %244 : vector<2x256xf32> to vector<1x2x256xf32>
    tpu.vector_store %arg13[%c0_103, %c0_104, %c0_105], %247 {strides = array<i32>} : memref<1x2x256xf32, #tpu.memory_space<vmem>>, vector<1x2x256xf32>,
    %248 = tpu.concatenate %230, %243 in 0 : vector<1x256xf32>, vector<2x256xf32> -> vector<3x256xf32>
    %c0_106 = arith.constant 0 : index
    %c0_107 = arith.constant 0 : index
    %c0_108 = arith.constant 0 : index
    %249 = vector.load %arg14[%c0_106, %c0_107, %c0_108] : memref<1x3x256xf32, #tpu.memory_space<vmem>>, vector<1x3x256xf32>
    %250 = vector.shape_cast %249 : vector<1x3x256xf32> to vector<3x256xf32>
    %251 = vector.shape_cast %248 : vector<3x256xf32> to vector<1x3x256xf32>
    tpu.vector_store %arg14[%c0_106, %c0_107, %c0_108], %251 {strides = array<i32>} : memref<1x3x256xf32, #tpu.memory_space<vmem>>, vector<1x3x256xf32>,
    return
  }
  func.func @transform_0(%arg0: i32) -> (i32, i32, i32) {
    %c0_i32 = arith.constant 0 : i32
    %c0_i32_0 = arith.constant 0 : i32
    %c0_i32_1 = arith.constant 0 : i32
    return %arg0, %c0_i32, %c0_i32_0 : i32, i32, i32
  }
  func.func @transform_1(%arg0: i32) -> (i32, i32) {
    %c0_i32 = arith.constant 0 : i32
    %c0_i32_0 = arith.constant 0 : i32
    %c0_i32_1 = arith.constant 0 : i32
    return %c0_i32, %c0_i32_0 : i32, i32
  }
  func.func @transform_2(%arg0: i32) -> (i32, i32) {
    %c0_i32 = arith.constant 0 : i32
    %c0_i32_0 = arith.constant 0 : i32
    %c0_i32_1 = arith.constant 0 : i32
    return %c0_i32, %c0_i32_0 : i32, i32
  }
  func.func @transform_3(%arg0: i32) -> (i32, i32) {
    %c0_i32 = arith.constant 0 : i32
    %c0_i32_0 = arith.constant 0 : i32
    %c0_i32_1 = arith.constant 0 : i32
    return %c0_i32, %c0_i32_0 : i32, i32
  }
  func.func @transform_4(%arg0: i32) -> (i32, i32) {
    %c0_i32 = arith.constant 0 : i32
    %c0_i32_0 = arith.constant 0 : i32
    %c0_i32_1 = arith.constant 0 : i32
    return %c0_i32, %c0_i32_0 : i32, i32
  }
  func.func @transform_5(%arg0: i32) -> (i32, i32) {
    %c0_i32 = arith.constant 0 : i32
    %c0_i32_0 = arith.constant 0 : i32
    %c0_i32_1 = arith.constant 0 : i32
    return %c0_i32, %c0_i32_0 : i32, i32
  }
  func.func @transform_6(%arg0: i32) -> (i32, i32) {
    %c0_i32 = arith.constant 0 : i32
    %c0_i32_0 = arith.constant 0 : i32
    %c0_i32_1 = arith.constant 0 : i32
    return %c0_i32, %c0_i32_0 : i32, i32
  }
  func.func @transform_7(%arg0: i32) -> (i32, i32) {
    %c0_i32 = arith.constant 0 : i32
    %c0_i32_0 = arith.constant 0 : i32
    %c0_i32_1 = arith.constant 0 : i32
    return %c0_i32, %c0_i32_0 : i32, i32
  }
  func.func @transform_8(%arg0: i32) -> (i32, i32) {
    %c0_i32 = arith.constant 0 : i32
    %c0_i32_0 = arith.constant 0 : i32
    %c0_i32_1 = arith.constant 0 : i32
    return %c0_i32, %c0_i32_0 : i32, i32
  }
  func.func @transform_9(%arg0: i32) -> (i32, i32) {
    %c0_i32 = arith.constant 0 : i32
    %c0_i32_0 = arith.constant 0 : i32
    %c0_i32_1 = arith.constant 0 : i32
    return %c0_i32, %c0_i32_0 : i32, i32
  }
  func.func @transform_10(%arg0: i32) -> (i32, i32) {
    %c0_i32 = arith.constant 0 : i32
    %c0_i32_0 = arith.constant 0 : i32
    %c0_i32_1 = arith.constant 0 : i32
    return %c0_i32, %c0_i32_0 : i32, i32
  }
  func.func @transform_11(%arg0: i32) -> (i32, i32) {
    %c0_i32 = arith.constant 0 : i32
    %c0_i32_0 = arith.constant 0 : i32
    %c0_i32_1 = arith.constant 0 : i32
    return %c0_i32, %c0_i32_0 : i32, i32
  }
  func.func @transform_12(%arg0: i32) -> (i32, i32, i32) {
    %c0_i32 = arith.constant 0 : i32
    %c0_i32_0 = arith.constant 0 : i32
    %c0_i32_1 = arith.constant 0 : i32
    return %arg0, %c0_i32, %c0_i32_0 : i32, i32, i32
  }
  func.func @transform_13(%arg0: i32) -> (i32, i32, i32) {
    %c0_i32 = arith.constant 0 : i32
    %c0_i32_0 = arith.constant 0 : i32
    %c0_i32_1 = arith.constant 0 : i32
    return %arg0, %c0_i32, %c0_i32_0 : i32, i32, i32
  }
}

</mosaic_0001>

<bundles_post_ra>
// kernel: classifier_forward.1
= control target key start
LH: loop header
LB: loop body
LE: loop exit
PB: predicated region body
PF: predicated region fallthrough
CT: control target
= control target key end

     0   :  { %s1292_s29 = smov 0   ;;  %s1633_s0 = inlined_call_operand.vmem [shape: f32[2,4,256], index: 0, kind: input, shape index: {}]   ;;  %s1634_s1 = inlined_call_operand.vmem [shape: s32[2,512], index: 1, kind: input, shape index: {}]   ;;  %s1635_s2 = inlined_call_operand.vmem [shape: f32[4,1], index: 2, kind: input, shape index: {}]   ;;  %s1636_s3 = inlined_call_operand.vmem [shape: f32[4,1], index: 3, kind: input, shape index: {}]   ;;  %s1637_s4 = inlined_call_operand.vmem [shape: f32[4,1], index: 4, kind: input, shape index: {}]   ;;  %s1638_s5 = inlined_call_operand.vmem [shape: f32[4,1], index: 5, kind: input, shape index: {}]   ;;  %s1639_s6 = inlined_call_operand.vmem [shape: f32[3,36], index: 6, kind: input, shape index: {}]   ;;  %s1640_s7 = inlined_call_operand.vmem [shape: f32[1,36], index: 7, kind: input, shape index: {}]   ;;  %s1641_s8 = inlined_call_operand.<no memory space> [shape: f32[1,1], index: 8, kind: input, shape index: {}]   ;;  %s1642_s10 = inlined_call_operand.vmem [shape: f32[2,1], index: 10, kind: input, shape index: {}]   ;;  %s1643_s11 = inlined_call_operand.vmem [shape: f32[2,1], index: 11, kind: input, shape index: {}]   ;;  %s1644_s12 = inlined_call_operand.vmem [shape: f32[2,2,256], index: 12, kind: output, shape index: {0}]   ;;  %s1645_s13 = inlined_call_operand.vmem [shape: f32[2,3,256], index: 13, kind: output, shape index: {1}]   ;;  %s1646_s9 = inlined_call_operand.<no memory space> [shape: f32[1,1], index: 9, kind: input, shape index: {}]  }
   0x1   :  { %v19_v0 = vstv %s1641_s8  ;;  %v21_v1 = vstv %s1646_s9 }
   0x2   :  { %20 = vst [vmem:[#allocation3] sm:$0x1] %v19_v0 }
   0x3   :  { %22 = vst [vmem:[#allocation4] sm:$0x1] %v21_v1 }
   0x4 LB: > { %s1142_s30 = sadd.s32 4294967295, %s1203_s29   ;;  %p1146_p0 = scmp.ge.s32.totalorder %s1203_s29, 1  ;;  %s1203_s29 = sphi %s1292_s29, %s28_s29  }
   0x5   : > { %p394_p1 = scmp.lt.s32.totalorder %s1203_s29, 3 }
   0x7   : > { %p395_p2 = pnand %p1146_p0, %p394_p1 }
   0x8   : > { %p443_p3 = scmp.lt.s32.totalorder (!%p395_p2), %s1142_s30, 1  ;;  %s1207_s24 = smov (!%p395_p2), 113  }
   0x9   : > { %398 = sbr.rel (%p395_p2) target bundleno = 495 (0x1ef), region = 68  ;;  %s1208_s25 = smov (!%p395_p2), 111  }
   0xa   : > { %s1209_s26 = smov (!%p395_p2), 112   ;;  %s1210_s27 = smov (!%p395_p2), 127  }
   0xb   : > { %s1211_s28 = smov (!%p395_p2), 1   ;;  %s1212_s8 = smov (!%p395_p2), 15  }
   0xc   : > { %s1213_s14 = smov (!%p395_p2), 16   ;;  %s1214_s9 = smov (!%p395_p2), 17  }
   0xe   : > { %v459_v2 = vld [vmem:[%s1635_s2] sm:$0xf]  ;;  %v1205_v3 = vmov 0   ;;  %s1652_s30 = smov (!%p443_p3, %s1142_s30), 1  ;;  %v1206_v7 = vmov 839922192   ;;  %v528_v40 = vlaneseq }
   0xf   : > { %1194 = vset.pattern.permute.xlu0 %v1205_v3  ;;  %1195 = vset.pattern.permute.xlu1 %v1205_v3  ;;  %v482_v4 = vld [vmem:[%s1637_s4] sm:$0xf]  ;;  %v465_v8 = vunpack.c.l.s4 %v1206_v7  ;;  %s1172_s20 = sshll.u32 %s1652_s30, 3  ;;  %v994_v29 = vld [vmem:[#allocation3] sm:$0x1]  ;;  %v1215_v43 = vmov 0.0  }
  0x10   : > { %462 = vperm.xlu0 %1194, %v459_v2   ;;  %485 = vperm.xlu1 %1195, %v482_v4   ;;  %v470_v5 = vld [vmem:[%s1636_s3] sm:$0xf]  ;;  %s447_s23 = scalar_lea.vmem %s1633_s0, %s1172_s20  ;;  %v1369_v42 = vand.u32 127, %v528_v40  ;;  %s457_s17 = scalar_lea.vmem %s1645_s13, %s1172_s20 }
  0x11   : > { %1196 = vset.pattern.permute.xlu2 %v1205_v3  ;;  %v493_v6 = vld [vmem:[%s1638_s5] sm:$0xf]  ;;  %v466_v11 = vunpack.c.0.s8 %v465_v8 }
  0x12   : > { %v458_v13 = vld [vmem:[%s447_s23] sm:$0xff]  ;;  %vm755_vm15 = vcmp.lt.s32.totalorder %v1369_v42, 113 }
  0x13   : > { %v1003_v30 = vld [vmem:[%s1643_s11] sm:$0x3] }
  0x14   : > { %v1021_v31 = vld [vmem:[%s1642_s10] sm:$0x3] }
  0x15   : > { %v517_v33 = vld [vmem:[%s1634_s1] ss:$2 sm:$0xf]  ;;  %v1346_v34 = vld [vmem:[%s1634_s1 + $0x1] ss:$2 sm:$0xf] }
  0x16   : > { %v760_v35 = vadd.s32 1, %v517_v33  ;;  %v1349_v36 = vadd.s32 4294967295, %v1346_v34  ;;  %v624_v39 = vadd.s32 1, %v1346_v34  ;;  %vm576_vm8 = vcmp.ge.s32.totalorder %v1346_v34, 0 }
  0x17   : > { %vm578_vm11 = vcmp.lt.s32.totalorder %v1346_v34, 16  ;;  %vm661_vm13 = vcmp.ge.s32.totalorder %v517_v33, 0  ;;  %vm662_vm14 = vcmp.lt.s32.totalorder %v517_v33, 16  ;;  %v535_v51 = vadd.s32 4294967295, %v517_v33 }
  0x18   : > { %473 = vperm.xlu0 %1194, %v470_v5   ;;  %496 = vperm.xlu1 %1195, %v493_v6   ;;  %vm761_vm0 = vcmp.ge.s32.totalorder %v760_v35, 0  ;;  %vm762_vm1 = vcmp.lt.s32.totalorder %v760_v35, 16  ;;  %vm540_vm2 = vcmp.ge.s32.totalorder %v1349_v36, 0  ;;  %vm542_vm4 = vcmp.lt.s32.totalorder %v1349_v36, 16 }
  0x19   : > { %vm1354_vm3 = vmand %vm761_vm0, %vm762_vm1  ;;  %vm625_vm7 = vcmp.ge.s32.totalorder %v624_v39, 0  ;;  %vm627_vm9 = vcmp.lt.s32.totalorder %v624_v39, 16 }
  0x1a   : > { %vm764_vm5 = vmand %vm1354_vm3, %vm540_vm2 }
  0x1b   : > { %vm765_vm6 = vmand %vm764_vm5, %vm542_vm4 }
  0x1c   : > { %v1372_v44 = vsel %vm765_vm6, 1.0, %v1215_v43  ;;  %vm844_vm10 = vmand %vm1354_vm3, %vm625_vm7  ;;  %vm839_vm6 = vcmp.lt.s32.totalorder %v1369_v42, 111 }
  0x1d   : > { %vm798_vm12 = vmand %vm1354_vm3, %vm576_vm8  ;;  %v769_v45 = vperm.slane %v1372_v44, 0  ;;  %v770_v36 = vperm.slane %v1372_v44, 1 }
  0x1e   : > { %vm845_vm0 = vmand %vm844_vm10, %vm627_vm9 }
  0x1f   : > { %vm799_vm1 = vmand %vm798_vm12, %vm578_vm11  ;;  %v1398_v50 = vsel %vm845_vm0, 1.0, %v1215_v43  ;;  %vm793_vm12 = vcmp.lt.s32.totalorder %v1369_v42, 112 }
  0x20   : > { %vm663_vm5 = vmand %vm661_vm13, %vm662_vm14  ;;  %v1401_v53 = vsel %vm799_vm1, 1.0, %v1215_v43  ;;  %v849_v54 = vperm.slane %v1398_v50, 0  ;;  %vm536_vm13 = vcmp.ge.s32.totalorder %v535_v51, 0  ;;  %vm537_vm14 = vcmp.lt.s32.totalorder %v535_v51, 16 }
  0x21   : > { %vm714_vm3 = vmand %vm663_vm5, %vm625_vm7  ;;  %v803_v55 = vperm.slane %v1401_v53, 0 }
  0x22   : > { %vm664_vm10 = vmand %vm663_vm5, %vm540_vm2 }
  0x23   : > { %vm715_vm0 = vmand %vm714_vm3, %vm627_vm9 }
  0x24   : > { %vm665_vm1 = vmand %vm664_vm10, %vm542_vm4  ;;  %v1432_v0 = vsel %vm715_vm0, 1.0, %v1215_v43 }
  0x25   : > { %vm1427_vm5 = vmand %vm536_vm13, %vm537_vm14  ;;  %v1435_v1 = vsel %vm665_vm1, 1.0, %v1215_v43  ;;  %vm709_vm13 = vcmp.lt.s32.totalorder %v1369_v42, 127  ;;  %v719_v3 = vperm.slane %v1432_v0, 0  ;;  %vm656_vm14 = vcmp.lt.s32.totalorder %v1369_v42, 1 }
  0x26   : > { %vm626_vm3 = vmand %vm1427_vm5, %vm625_vm7  ;;  %v670_v4 = vperm.slane %v1435_v1, 1  ;;  %vm571_vm1 = vcmp.lt.s32.totalorder %v1369_v42, 16  ;;  %v720_v51 = vperm.slane %v1432_v0, 1 }
  0x27   : > { %vm577_vm10 = vmand %vm1427_vm5, %vm576_vm8  ;;  %vm880_vm8 = vcmask 1043456  }
  0x28   : > { %vm628_vm0 = vmand %vm626_vm3, %vm627_vm9 }
  0x29   : > { %vm579_vm7 = vmand %vm577_vm10, %vm578_vm11  ;;  %vm619_vm11 = vcmp.lt.s32.totalorder %v1369_v42, 15 }
  0x2a   : > { %vm541_vm9 = vmand %vm1427_vm5, %vm540_vm2 }
  0x2b   : > { %vm543_vm2 = vmand %vm541_vm9, %vm542_vm4  ;;  %vm530_vm4 = vcmp.lt.s32.totalorder %v1369_v42, 17 }
  0x82   : > { %v463_v9 = vpop.permute.xlu0 %462  ;;  %v486_v10 = vpop.permute.xlu1 %485 }
  0x83   : > { %v467_v12 = vperm.slane %v463_v9, %v466_v11  ;;  %v490_v17 = vperm.slane %v486_v10, %v466_v11 }
  0x85   : > { %v469_v15 = vmul.f32 %v467_v12, %v458_v13  ;;  %v492_v21 = vmul.f32 %v490_v17, %v458_v13  ;;  %v1466_v13 = vsel %vm628_vm0, 1.0, %v1215_v43 }
  0x8a   : > { %v474_v14 = vpop.permute.xlu0 %473  ;;  %v497_v18 = vpop.permute.xlu1 %496 }
  0x8b   : > { %v478_v16 = vperm.slane %v474_v14, %v466_v11  ;;  %v501_v22 = vperm.slane %v497_v18, %v466_v11  ;;  %v1469_v14 = vsel %vm579_vm7, 1.0, %v1215_v43  ;;  %v633_v18 = vperm.slane %v1466_v13, 1 }
  0x8d   : > { %v480_v19 = vadd.f32 %v478_v16, %v469_v15  ;;  %v503_v23 = vadd.f32 %v501_v22, %v492_v21 }
  0x8f   : > { %v481_v20 = vmax.f32 %v480_v19, 0.0  ;;  %v504_v24 = vmax.f32 %v503_v23, 0.0  ;;  %v584_v19 = vperm.slane %v1469_v14, 1 }
  0x91   : > { %506 = vst [vmem:[#allocation1] ss:$2 sm:$0xff] %v481_v20  ;;  %v804_v20 = vperm.slane %v1401_v53, 1 }
  0x98   : > { %v508_v25 = vld.sshfl [vmem:[#allocation1 + $0x8] sm:$0xff pattern:$0x75316420]  ;;  %v507_v26 = vld.sshfl [vmem:[#allocation1] sm:$0xff pattern:$0x75316420] }
  0x99   : > { %749 = vrot.lane.b32.xlu1 %v508_v25, %s1207_s24  ;;  %698 = vst [vmem:[#allocation2 + $0x88] sm:$0xf] %v508_v25  ;;  %833 = vrot.lane.b32.xlu0 %v508_v25, %s1208_s25 }
  0x9a   : > { %787 = vrot.lane.b32.xlu2 %v508_v25, %s1209_s26  ;;  %697 = vst [vmem:[#allocation2 + $0x8] sm:$0xf] %v507_v26 }
  0x9b   : > { %512 = vst [vmem:[#allocation1] ss:$2 sm:$0xff] %v504_v24 }
  0xa1   : > { %831 = vrot.lane.b32.xlu1 %v507_v26, %s1208_s25  ;;  %785 = vrot.lane.b32.xlu0 %v507_v26, %s1209_s26 }
  0xa2   : > { %703 = vrot.lane.b32.xlu2 %v508_v25, %s1210_s27  ;;  %v513_v27 = vld.sshfl [vmem:[#allocation1] sm:$0xff pattern:$0x75316420]  ;;  %v514_v28 = vld.sshfl [vmem:[#allocation1 + $0x8] sm:$0xff pattern:$0x75316420] }
  0xa3   : > { %699 = vst [vmem:[#allocation2 + $0x28] sm:$0xf] %v513_v27 }
  0xa4   : > { %700 = vst [vmem:[#allocation2 + $0x40] sm:$0xf] %v514_v28 }
  0xa9   : > { %701 = vrot.lane.b32.xlu1 %v507_v26, %s1210_s27  ;;  %650 = vrot.lane.b32.xlu0 %v508_v25, %s1211_s28 }
  0xaa   : > { %648 = vrot.lane.b32.xlu2 %v507_v26, %s1211_s28 }
  0xb1   : > { %611 = vrot.lane.b32.xlu1 %v507_v26, %s1212_s8  ;;  %565 = vrot.lane.b32.xlu0 %v508_v25, %s1213_s14 }
  0xb2   : > { %747 = vrot.lane.b32.xlu2 %v507_v26, %s1207_s24 }
  0xb9   : > { %522 = vrot.lane.b32.xlu1 %v508_v25, %s1214_s9  ;;  %520 = vrot.lane.b32.xlu0 %v507_v26, %s1214_s9 }
  0xba   : > { %563 = vrot.lane.b32.xlu2 %v507_v26, %s1213_s14 }
  0xc1   : > { %705 = vrot.lane.b32.xlu0 %v513_v27, %s1210_s27  ;;  %835 = vrot.lane.b32.xlu1 %v513_v27, %s1208_s25 }
  0xc2   : > { %613 = vrot.lane.b32.xlu2 %v508_v25, %s1212_s8 }
  0xc9   : > { %791 = vrot.lane.b32.xlu0 %v514_v28, %s1209_s26  ;;  %837 = vrot.lane.b32.xlu1 %v514_v28, %s1208_s25 }
  0xca   : > { %789 = vrot.lane.b32.xlu2 %v513_v27, %s1209_s26 }
  0xd1   : > { %654 = vrot.lane.b32.xlu0 %v514_v28, %s1211_s28  ;;  %707 = vrot.lane.b32.xlu1 %v514_v28, %s1210_s27 }
  0xd2   : > { %751 = vrot.lane.b32.xlu2 %v513_v27, %s1207_s24 }
  0xd9   : > { %617 = vrot.lane.b32.xlu0 %v514_v28, %s1212_s8  ;;  %652 = vrot.lane.b32.xlu1 %v513_v27, %s1211_s28  ;;  %s1173_s28 = sshll.u32 %s1652_s30, 2 }
  0xda   : > { %753 = vrot.lane.b32.xlu2 %v514_v28, %s1207_s24 }
  0xe1   : > { %567 = vrot.lane.b32.xlu0 %v513_v27, %s1213_s14  ;;  %615 = vrot.lane.b32.xlu1 %v513_v27, %s1212_s8 }
  0xe2   : > { %569 = vrot.lane.b32.xlu2 %v514_v28, %s1213_s14 }
  0xe9   : > { %997 = vperm.xlu0 %1194, %v994_v29   ;;  %1006 = vperm.xlu1 %1195, %v1003_v30   ;;  %v1499_v30 = vsel %vm543_vm2, 1.0, %v1215_v43 }
  0xea   : > { %526 = vrot.lane.b32.xlu2 %v514_v28, %s1214_s9  ;;  %v548_v35 = vperm.slane %v1499_v30, 1 }
  0xf1   : > { %1024 = vperm.xlu0 %1194, %v1021_v31  }
  0xf2   : > { %524 = vrot.lane.b32.xlu2 %v513_v27, %s1214_s9  ;;  %s452_s9 = scalar_lea.vmem %s1644_s12, %s1173_s28 }
  0xf4   : > { %v1338_v32 = vpop.permute.xlu2 %787 }
  0xfc   : > { %v1351_v37 = vpop.permute.xlu2 %703 }
 0x104   : > { %v1364_v41 = vpop.permute.xlu2 %648 }
 0x10b   : > { %v1385_v46 = vpop.permute.xlu1 %749  ;;  %v1387_v47 = vpop.permute.xlu0 %833 }
 0x10c   : > { %v1391_v48 = vpop.permute.xlu2 %747 }
 0x10d   : > { %v758_v49 = vsel %vm755_vm15, %v1391_v48, %v1385_v46 }
 0x10e   : > { %v777_v52 = vmul.f32 %v769_v45, %v758_v49 }
 0x110   : > { %781 = vst [vmem:[#allocation2 + $0x58] sm:$0xf] %v777_v52  ;;  %v850_v52 = vperm.slane %v1398_v50, 1 }
 0x113   : > { %v1411_v56 = vpop.permute.xlu1 %831  ;;  %v1413_v57 = vpop.permute.xlu0 %785 }
 0x114   : > { %v1417_v58 = vpop.permute.xlu2 %563  ;;  %v842_v59 = vsel %vm839_vm6, %v1411_v56, %v1387_v47  ;;  %v796_v60 = vsel %vm793_vm12, %v1413_v57, %v1338_v32 }
 0x115   : > { %v857_v62 = vmul.f32 %v849_v54, %v842_v59  ;;  %v811_v63 = vmul.f32 %v803_v55, %v796_v60  ;;  %v771_v54 = vperm.slane %v1372_v44, 2  ;;  %v772_v55 = vperm.slane %v1372_v44, 3 }
 0x117   : > { %861 = vst [vmem:[#allocation2 + $0x20] sm:$0xf] %v857_v62  ;;  %v819_v2 = vrot.slane %v811_v63, 4 }
 0x119   : > { %827 = vst [vmem:[#allocation2 + $0x58] sm:$0xf0] %v819_v2 }
 0x11b   : > { %v1449_v5 = vpop.permute.xlu1 %701  ;;  %v1451_v6 = vpop.permute.xlu0 %650 }
 0x11c   : > { %v1455_v7 = vpop.permute.xlu2 %613  ;;  %v712_v8 = vsel %vm709_vm13, %v1449_v5, %v1351_v37  ;;  %v659_v9 = vsel %vm656_vm14, %v1364_v41, %v1451_v6 }
 0x11d   : > { %v727_v10 = vmul.f32 %v719_v3, %v712_v8  ;;  %v678_v11 = vmul.f32 %v670_v4, %v659_v9 }
 0x11e   : > { %v874_v12 = vld [vmem:[#allocation2 + $0x20] sm:$0xf] }
 0x11f   : > { %v735_v15 = vrot.slane %v727_v10, 4  ;;  %v686_v16 = vrot.slane %v678_v11, 4  ;;  %1162 = vmatpush.msk.msra.mxu0 %vm880_vm8, %v874_v12  ;;  %v851_v10 = vperm.slane %v1398_v50, 2  ;;  %v852_v11 = vperm.slane %v1398_v50, 3 }
 0x120   : > { %v872_v17 = vld [vmem:[#allocation2 + $0x58] sm:$0xff] }
 0x121   : > { %743 = vst [vmem:[#allocation2 + $0x8] sm:$0xf0] %v735_v15  ;;  %899 = vmatpush.msra.mxu0 %v872_v17 }
 0x122   : > { %694 = vst [vmem:[#allocation2 + $0x68] sm:$0xf0] %v686_v16  ;;  %v583_v16 = vperm.slane %v1469_v14, 0 }
 0x123   : > { %v1481_v21 = vpop.permute.xlu1 %611  ;;  %v1483_v22 = vpop.permute.xlu0 %565 }
 0x124   : > { %v622_v23 = vsel %vm619_vm11, %v1481_v21, %v1455_v7  ;;  %v574_v24 = vsel %vm571_vm1, %v1417_v58, %v1483_v22  ;;  %v790_v25 = vpop.permute.xlu2 %789 }
 0x125   : > { %v641_v26 = vmul.f32 %v633_v18, %v622_v23  ;;  %v592_v27 = vmul.f32 %v584_v19, %v574_v24  ;;  %v795_v28 = vsel %vm793_vm12, %v1338_v32, %v790_v25 }
 0x126   : > { %v812_v29 = vmul.f32 %v804_v20, %v795_v28 }
 0x127   : > { %645 = vst [vmem:[#allocation2 + $0x68] sm:$0xf] %v641_v26  ;;  %v600_v31 = vrot.slane %v592_v27, 4 }
 0x128   : > { %v820_v33 = vrot.slane %v812_v29, 4  ;;  %v870_v34 = vld [vmem:[#allocation2 + $0x8] sm:$0xff] }
 0x129   : > { %608 = vst [vmem:[#allocation2 + $0x38] sm:$0xf0] %v600_v31  ;;  %900 = vmatpush.msra.mxu0 %v870_v34  ;;  %v669_v31 = vperm.slane %v1435_v1, 0  ;;  %v722_v34 = vperm.slane %v1432_v0, 3 }
 0x12a   : > { %828 = vst [vmem:[#allocation2 + $0x10] sm:$0xf0] %v820_v33  ;;  %v721_v33 = vperm.slane %v1432_v0, 2 }
 0x12b   : > { %v1504_v38 = vpop.permute.xlu1 %522  ;;  %v1506_v32 = vpop.permute.xlu0 %520 }
 0x12c   : > { %v533_v39 = vsel %vm530_vm4, %v1506_v32, %v1504_v38  ;;  %v752_v40 = vpop.permute.xlu2 %751 }
 0x12d   : > { %v556_v43 = vmul.f32 %v548_v35, %v533_v39  ;;  %v757_v45 = vsel %vm755_vm15, %v1385_v46, %v752_v40  ;;  %v547_v35 = vperm.slane %v1499_v30, 0 }
 0x12e   : > { %v778_v49 = vmul.f32 %v770_v36, %v757_v45 }
 0x12f   : > { %560 = vst [vmem:[#allocation2 + $0x38] sm:$0xf] %v556_v43 }
 0x130   : > { %782 = vst [vmem:[#allocation2 + $0x10] sm:$0xf] %v778_v49  ;;  %v869_v49 = vld [vmem:[#allocation2 + $0x68] sm:$0xff] }
 0x133   : > { %v706_v59 = vpop.permute.xlu0 %705  ;;  %v836_v60 = vpop.permute.xlu1 %835 }
 0x134   : > { %v711_v61 = vsel %vm709_vm13, %v1351_v37, %v706_v59  ;;  %v841_v46 = vsel %vm839_vm6, %v1387_v47, %v836_v60  ;;  %v754_v62 = vpop.permute.xlu2 %753  ;;  %v805_v37 = vperm.slane %v1401_v53, 2  ;;  %v806_v47 = vperm.slane %v1401_v53, 3 }
 0x135   : > { %v728_v63 = vmul.f32 %v720_v51, %v711_v61  ;;  %v858_v2 = vmul.f32 %v850_v52, %v841_v46  ;;  %v756_v3 = vsel %vm755_vm15, %v752_v40, %v754_v62  ;;  %v759_v44 = vsel %vm755_vm15, %v754_v62, %v1391_v48  ;;  %v938_v51 = vld [vmem:[#allocation4] sm:$0x1] }
 0x136   : > { %v779_v4 = vmul.f32 %v771_v54, %v756_v3  ;;  %v780_v8 = vmul.f32 %v772_v55, %v759_v44  ;;  %vm876_vm15 = vcmask 293888   ;;  %v867_v61 = vld [vmem:[#allocation2 + $0x38] sm:$0xff]  ;;  %941 = vperm.xlu2 %1196, %v938_v51   ;;  %v632_v44 = vperm.slane %v1466_v13, 0 }
 0x137   : > { %v736_v9 = vrot.slane %v728_v63, 4  ;;  %862 = vst [vmem:[#allocation2 + $0x48] sm:$0xf] %v858_v2 }
 0x138   : > { %783 = vst [vmem:[#allocation2 + $0x98] sm:$0xf] %v779_v4  ;;  %v671_v4 = vperm.slane %v1435_v1, 2 }
 0x139   : > { %744 = vst [vmem:[#allocation2 + $0x88] sm:$0xf0] %v736_v9  ;;  %v550_v9 = vperm.slane %v1499_v30, 3 }
 0x13a   : > { %784 = vst [vmem:[#allocation2 + $0x60] sm:$0xf] %v780_v8  ;;  %v672_v8 = vperm.slane %v1435_v1, 3 }
 0x13b   : > { %v792_v12 = vpop.permute.xlu0 %791  ;;  %v838_v15 = vpop.permute.xlu1 %837 }
 0x13c   : > { %v794_v48 = vsel %vm793_vm12, %v790_v25, %v792_v12  ;;  %v797_v17 = vsel %vm793_vm12, %v792_v12, %v1413_v57  ;;  %v840_v18 = vsel %vm839_vm6, %v836_v60, %v838_v15  ;;  %v843_v53 = vsel %vm839_vm6, %v838_v15, %v1411_v56  ;;  %v1545_v50 = vpop.permute.xlu2 %569  ;;  %v873_v56 = vld [vmem:[#allocation2 + $0x10] sm:$0xff] }
 0x13d   : > { %v813_v19 = vmul.f32 %v805_v37, %v794_v48  ;;  %v814_v20 = vmul.f32 %v806_v47, %v797_v17  ;;  %v859_v23 = vmul.f32 %v851_v10, %v840_v18  ;;  %v860_v24 = vmul.f32 %v852_v11, %v843_v53 }
 0x13e   : > { %v575_v25 = vsel %vm571_vm1, %v1545_v50, %v1417_v58  ;;  %v875_v26 = vld [vmem:[#allocation2 + $0x48] sm:$0xf]  ;;  %v549_v10 = vperm.slane %v1499_v30, 2  ;;  %vm1036_vm6 = vcmask 1040384   ;;  %vm1042_vm12 = vcmask 1041408  }
 0x13f   : > { %v821_v57 = vrot.slane %v813_v19, 4  ;;  %v822_v27 = vrot.slane %v814_v20, 4  ;;  %863 = vst [vmem:[#allocation2 + $0x70] sm:$0xf] %v859_v23  ;;  %v591_v28 = vmul.f32 %v583_v16, %v575_v25  ;;  %1164 = vmatpush.msk.msra.mxu1 %vm880_vm8, %v875_v26  ;;  %v585_v23 = vperm.slane %v1469_v14, 2 }
 0x140   : > { %864 = vst [vmem:[#allocation2 + $0x90] sm:$0xf] %v860_v24  ;;  %v871_v58 = vld [vmem:[#allocation2 + $0x88] sm:$0xff]  ;;  %v586_v24 = vperm.slane %v1469_v14, 3  ;;  %v634_v25 = vperm.slane %v1466_v13, 2  ;;  %v635_v26 = vperm.slane %v1466_v13, 3 }
 0x141   : > { %829 = vst [vmem:[#allocation2 + $0x98] sm:$0xf0] %v821_v57  ;;  %v599_v29 = vrot.slane %v591_v28, 4  ;;  %919 = vmatpush.msra.mxu1 %v873_v56 }
 0x142   : > { %830 = vst [vmem:[#allocation2 + $0x60] sm:$0xf0] %v822_v27 }
 0x143   : > { %607 = vst [vmem:[#allocation2] sm:$0xf0] %v599_v29  ;;  %v655_v36 = vpop.permute.xlu0 %654  ;;  %v708_v39 = vpop.permute.xlu1 %707  ;;  %920 = vmatpush.msra.mxu1 %v871_v58 }
 0x144   : > { %v660_v40 = vsel %vm656_vm14, %v655_v36, %v1364_v41  ;;  %v710_v43 = vsel %vm709_vm13, %v706_v59, %v708_v39  ;;  %v713_v45 = vsel %vm709_vm13, %v708_v39, %v1449_v5  ;;  %v527_v0 = vpop.permute.xlu2 %526  ;;  %v1570_v41 = vld [vmem:[%s1639_s6] sm:$0x7] }
 0x145   : > { %v677_v52 = vmul.f32 %v669_v31, %v660_v40  ;;  %v729_v54 = vmul.f32 %v721_v33, %v710_v43  ;;  %v730_v55 = vmul.f32 %v722_v34, %v713_v45  ;;  %v534_v60 = vsel %vm530_vm4, %v527_v0, %v1506_v32  ;;  %921 = vmatpush.msra.mxu1 %v869_v49 }
 0x146   : > { %v555_v59 = vmul.f32 %v547_v35, %v534_v60  ;;  %v936_v5 = vld [vmem:[#allocation2 + $0x70] sm:$0xf] }
 0x147   : > { %v685_v46 = vrot.slane %v677_v52, 4  ;;  %v737_v62 = vrot.slane %v729_v54, 4  ;;  %v738_v63 = vrot.slane %v730_v55, 4  ;;  %922 = vmatpush.msra.mxu1 %v867_v61  ;;  %1166 = vmatpush.msk.msra.mxu2 %vm880_vm8, %v936_v5  ;;  %v937_v2 = vld [vmem:[#allocation2 + $0x90] sm:$0xf] }
 0x148   : > { %559 = vst [vmem:[#allocation2] sm:$0xf] %v555_v59  ;;  %1168 = vmatpush.msk.msra.mxu3 %vm880_vm8, %v937_v2  ;;  %1165 = vmatmul.msk.f32.vlgmr.msra.gmra.mxu1 %vm876_vm15, %v1570_v41  ;;  %v934_v32 = vld [vmem:[#allocation2 + $0x98] sm:$0xff] }
 0x149   : > { %693 = vst [vmem:[#allocation2 + $0x30] sm:$0xf0] %v685_v46  ;;  %966 = vmatpush.msra.mxu2 %v934_v32  ;;  %v935_v3 = vld [vmem:[#allocation2 + $0x60] sm:$0xff] }
 0x14a   : > { %745 = vst [vmem:[#allocation2 + $0x28] sm:$0xf0] %v737_v62  ;;  %986 = vmatpush.msra.mxu3 %v935_v3 }
 0x14b   : > { %746 = vst [vmem:[#allocation2 + $0x40] sm:$0xf0] %v738_v63  ;;  %v618_v37 = vpop.permute.xlu0 %617  ;;  %v653_v47 = vpop.permute.xlu1 %652 }
 0x14c   : > { %v623_v11 = vsel %vm619_vm11, %v618_v37, %v1481_v21  ;;  %v657_v12 = vsel %vm656_vm14, %v653_v47, %v655_v36  ;;  %v658_v1 = vsel %vm656_vm14, %v1451_v6, %v653_v47  ;;  %v525_v15 = vpop.permute.xlu2 %524 }
 0x14d   : > { %v640_v16 = vmul.f32 %v632_v44, %v623_v11  ;;  %v679_v48 = vmul.f32 %v671_v4, %v658_v1  ;;  %v680_v17 = vmul.f32 %v672_v8, %v657_v12  ;;  %v531_v18 = vsel %vm530_vm4, %v525_v15, %v527_v0 }
 0x14e   : > { %v532_v30 = vsel %vm530_vm4, %v1504_v38, %v525_v15  ;;  %v558_v53 = vmul.f32 %v550_v9, %v531_v18 }
 0x14f   : > { %644 = vst [vmem:[#allocation2 + $0x30] sm:$0xf] %v640_v16  ;;  %v687_v21 = vrot.slane %v679_v48, 4  ;;  %v688_v19 = vrot.slane %v680_v17, 4  ;;  %v557_v20 = vmul.f32 %v549_v10, %v532_v30 }
 0x150   : > { %562 = vst [vmem:[#allocation2 + $0x18] sm:$0xf] %v558_v53 }
 0x151   : > { %695 = vst [vmem:[#allocation2 + $0x78] sm:$0xf0] %v687_v21  ;;  %v932_v6 = vld [vmem:[#allocation2 + $0x28] sm:$0xff] }
 0x152   : > { %696 = vst [vmem:[#allocation2 + $0x80] sm:$0xf0] %v688_v19  ;;  %967 = vmatpush.msra.mxu2 %v932_v6  ;;  %v933_v57 = vld [vmem:[#allocation2 + $0x40] sm:$0xff] }
 0x153   : > { %561 = vst [vmem:[#allocation2 + $0x50] sm:$0xf] %v557_v20  ;;  %987 = vmatpush.msra.mxu3 %v933_v57  ;;  %v568_v38 = vpop.permute.xlu0 %567  ;;  %v616_v27 = vpop.permute.xlu1 %615 }
 0x154   : > { %v572_v28 = vsel %vm571_vm1, %v568_v38, %v1545_v50  ;;  %v573_v56 = vsel %vm571_vm1, %v1483_v22, %v568_v38  ;;  %v620_v14 = vsel %vm619_vm11, %v616_v27, %v618_v37  ;;  %v621_v13 = vsel %vm619_vm11, %v1455_v7, %v616_v27  ;;  %v866_v50 = vld [vmem:[#allocation2] sm:$0xff]  ;;  %v927_v7 = vld [vmem:[%s1640_s7] sm:$0x1] }
 0x155   : > { %v593_v29 = vmul.f32 %v585_v23, %v573_v56  ;;  %v594_v31 = vmul.f32 %v586_v24, %v572_v28  ;;  %v642_v33 = vmul.f32 %v634_v25, %v621_v13  ;;  %v643_v34 = vmul.f32 %v635_v26, %v620_v14 }
 0x156   : > { %v868_v58 = vld [vmem:[#allocation2 + $0x30] sm:$0xff] }
 0x157   : > { %v601_v35 = vrot.slane %v593_v29, 4  ;;  %v602_v36 = vrot.slane %v594_v31, 4  ;;  %646 = vst [vmem:[#allocation2 + $0x78] sm:$0xf] %v642_v33  ;;  %901 = vmatpush.msra.mxu0 %v868_v58 }
 0x158   : > { %647 = vst [vmem:[#allocation2 + $0x80] sm:$0xf] %v643_v34 }
 0x159   : > { %609 = vst [vmem:[#allocation2 + $0x50] sm:$0xf0] %v601_v35  ;;  %902 = vmatpush.msra.mxu0 %v866_v50 }
 0x15a   : > { %610 = vst [vmem:[#allocation2 + $0x18] sm:$0xf0] %v602_v36  ;;  %1163 = vmatmul.msk.f32.vlgmr.msra.gmra.mxu0 %vm876_vm15, %v1570_v41 }
 0x15b   : > { %v998_v43 = vpop.permute.xlu0 %997  ;;  %v1007_v55 = vpop.permute.xlu1 %1006 }
 0x15c   : > { %v1000_v0 = vperm.slane %v998_v43, 0 }
 0x15e   : > { %v930_v22 = vld [vmem:[#allocation2 + $0x78] sm:$0xff] }
 0x15f   : > { %968 = vmatpush.msra.mxu2 %v930_v22  ;;  %v931_v42 = vld [vmem:[#allocation2 + $0x80] sm:$0xff] }
 0x160   : > { %988 = vmatpush.msra.mxu3 %v931_v42  ;;  %v928_v39 = vld [vmem:[#allocation2 + $0x50] sm:$0xff] }
 0x161   : > { %969 = vmatpush.msra.mxu2 %v928_v39  ;;  %v929_v40 = vld [vmem:[#allocation2 + $0x18] sm:$0xff] }
 0x162   : > { %989 = vmatpush.msra.mxu3 %v929_v40  ;;  %1167 = vmatmul.msk.f32.vlgmr.msra.gmra.mxu2 %vm876_vm15, %v927_v7 }
 0x163   : > { %1169 = vmatmul.msk.f32.vlgmr.msra.gmra.mxu3 %vm876_vm15, %v927_v7  ;;  %v1025_v62 = vpop.permute.xlu0 %1024 }
 0x164   : > { %v1026_v32 = vrot.slane %v1025_v62, 7 }
 0x190   : > { %v942_v5 = vpop.permute.xlu2 %941 }
 0x191   : > { %v944_v2 = vperm.slane %v942_v5, 0 }
 0x1c5   : > { %v924_v45 = vpop.f32.mrf.mxu1 }
 0x1c6   : > { %v1002_v49 = vadd.f32 %v1000_v0, %v924_v45 }
 0x1c8   : > { %v1010_v51 = vperm.slane %v1002_v49, 0  ;;  %v1033_v9 = vrot.slane %v1002_v49, 7 }
 0x1ca   : > { %v1012_v41 = vmul.f32 %v1010_v51, %v1007_v55 }
 0x1cc   : > { %v1016_v61 = vrot.slane %v1012_v41, 7 }
 0x1ce   : > { %v1020_v63 = vadd.f32 %v1016_v61, %v924_v45 }
 0x1d0   : > { %v1029_v8 = vadd.f32 %v1026_v32, %v1020_v63 }
 0x1d7   : > { %v904_v52 = vpop.f32.mrf.mxu0 }
 0x1d8   : > { %v1001_v54 = vadd.f32 %v1000_v0, %v904_v52 }
 0x1da   : > { %v1009_v60 = vperm.slane %v1001_v54, 0  ;;  %v1032_v11 = vrot.slane %v1001_v54, 7 }
 0x1dc   : > { %v1011_v59 = vmul.f32 %v1009_v60, %v1007_v55 }
 0x1de   : > { %v1015_v46 = vrot.slane %v1011_v59, 7 }
 0x1e0   : > { %v1019_v3 = vadd.f32 %v1015_v46, %v904_v52 }
 0x1e2   : > { %v1028_v10 = vadd.f32 %v1026_v32, %v1019_v3 }
 0x1e5   : > { %v971_v44 = vpop.f32.mrf.mxu2 }
 0x1e6   : > { %v991_v4 = vpop.f32.mrf.mxu3  ;;  %v972_v37 = vadd.f32 %v971_v44, %v944_v2 }
 0x1e7   : > { %v992_v47 = vadd.f32 %v991_v4, %v944_v2 }
 0x1e8   : > { %v1037_v48 = vsel %vm1036_vm6, %v972_v37, %v1032_v11  ;;  %v1046_v17 = vsel %vm1036_vm6, %v972_v37, %v1028_v10 }
 0x1e9   : > { %v1038_v12 = vsel %vm1036_vm6, %v992_v47, %v1033_v9  ;;  %v1047_v1 = vsel %vm1036_vm6, %v992_v47, %v1029_v8 }
 0x1ea   : > { %v1041_v15 = vrot.slane %v1038_v12, 6  ;;  %v1050_v16 = vrot.slane %v1047_v1, 4 }
 0x1ec   : > { %v1043_v18 = vsel %vm1042_vm12, %v1037_v48, %v1041_v15  ;;  %v1051_v30 = vsel %vm880_vm8, %v1046_v17, %v1050_v16 }
 0x1ed   : > { %1045 = vst [vmem:[%s452_s9] sm:$0xf] %v1043_v18 }
 0x1ee   : > { %1053 = vst [vmem:[%s457_s17] sm:$0x77] %v1051_v30 }
 0x1ef PF: > { %s28_s29 = sadd.s32 1, %s1203_s29  }
 0x1f0   : > { %p25_p4 = scmp.ge.s32.totalorder %s28_s29, 4  }
 0x1f2   :  { %27 = sbr.rel (!%p25_p4) target bundleno = 4 (0x4), region = 111 }

</bundles_post_ra>
